<compile_context>
chip_gen: v7x
topology: tpu7x:2x2x1
jax: 0.10.0
libtpu: 0.0.40
codegen_flags: <defaults>
</compile_context>

<pallas_src>
import functools

import jax
import jax.numpy as jnp
from jax.experimental import pallas as pl
from jax.experimental.pallas import tpu as pltpu

C_IN = 336       # conv2d91 in_channels  / conv2d92 out_channels
C_MID = 84       # conv2d91 out_channels / conv2d92 in_channels
C_MID_PAD = 128  # lane-dense mid width (resident weights only, never streamed)
MAX_TM = 1024    # max rows per grid step (amortizes ~0.35us/step overhead)


def _cdiv(a, b):
    return (a + b - 1) // b


def _round_up(x, m):
    return (x + m - 1) // m * m


def _tile_rows(n):
    """Tile-count-first row tiling: minimal dead rows, >=2 even steps for v7x."""
    tiles = max(_cdiv(n, MAX_TM), 2 if n > 64 else 1)
    if tiles > 1 and tiles % 2:
        tiles += 1                      # even step count balances v7x megacore
    if tiles == 1:
        return 1, n                     # block == full array: always layout-legal
    return tiles, _round_up(_cdiv(n, tiles), 16)


def se_block_kernel(x_ref, w1_ref, b1_ref, w2_ref, b2_ref, o_ref):
    # x_ref : [TM, 336] f32      w1_ref: [336, 128] bf16   b1_ref: [1, 128] f32
    # w2_ref: [128, 336] bf16    b2_ref: [1, 336]   f32    o_ref : [TM, 336] bf16/f32
    x = x_ref[...].astype(jnp.bfloat16)          # in-kernel cast (VPU, hidden by DMA)

    # conv2d91 (1x1 conv == channel matmul): bf16 MXU, f32 accumulation; relu71.
    h = jnp.dot(x, w1_ref[...], preferred_element_type=jnp.float32) + b1_ref[...]
    h = jnp.maximum(h, 0.0)

    # conv2d92: bf16 MXU again, f32 accumulation + bias.
    y = jnp.dot(h.astype(jnp.bfloat16), w2_ref[...],
                preferred_element_type=jnp.float32) + b2_ref[...]

    # sigmoid17 as 0.5*tanh(0.5*y)+0.5: single EUP transcendental (no exp+recip).
    if o_ref.dtype == jnp.bfloat16:
        y = y.astype(jnp.bfloat16)               # bf16 EUP/VPU epilogue (v6e/v7x)
    o_ref[...] = (jnp.tanh(y * 0.5) * 0.5 + 0.5).astype(o_ref.dtype)


def prepare_params(w1, b1, w2, b2):
    """One-time weight prep (hoisted out of the per-call path).

    w1: [84, 336]  b1: [84]  w2: [336, 84]  b2: [336]  (PyTorch conv weights
    with the trailing 1x1 spatial dims squeezed).  Weights are transposed to
    channel-last, mid channel zero-padded 84 -> 128 (lane-dense), cast to bf16;
    biases stay f32.  The 336-wide dims are left unpadded (full-array blocks).
    """
    w1_t = jnp.zeros((C_IN, C_MID_PAD), jnp.float32).at[:, :C_MID].set(w1.T)
    w2_t = jnp.zeros((C_MID_PAD, C_IN), jnp.float32).at[:C_MID, :].set(w2.T)
    b1_p = jnp.zeros((1, C_MID_PAD), jnp.float32).at[0, :C_MID].set(b1)
    b2_p = b2.reshape(1, C_IN).astype(jnp.float32)
    return w1_t.astype(jnp.bfloat16), b1_p, w2_t.astype(jnp.bfloat16), b2_p


@functools.partial(jax.jit, static_argnames=("out_dtype",))
def se_block(x_nchw, w1_p, b1_p, w2_p, b2_p, *, out_dtype=jnp.bfloat16):
    """x_nchw: [N, 336, 1, 1] f32 -> [N, 336, 1, 1] sigmoid gate.

    Default output is bf16 (intentional precision trade for a [0, 1] SE gate,
    ~2e-3 abs error); pass out_dtype=jnp.float32 for the exact PyTorch dtype.
    """
    n = x_nchw.shape[0]
    assert x_nchw.shape == (n, C_IN, 1, 1)

    x2d = x_nchw.reshape(n, C_IN)          # free: H = W = 1, no pad/cast/copy pass
    tiles, tm = _tile_rows(n)

    out_bytes = jnp.dtype(out_dtype).itemsize
    cost = pl.CostEstimate(
        flops=4 * n * C_IN * C_MID_PAD + 8 * n * C_IN,
        transcendentals=n * C_IN,
        bytes_accessed=n * C_IN * (4 + out_bytes)       # x f32 in + gate out
        + 2 * C_IN * C_MID_PAD * 2                      # two resident bf16 weights
        + (C_MID_PAD + C_IN) * 4,                       # f32 biases
    )

    out = pl.pallas_call(
        se_block_kernel,
        out_shape=jax.ShapeDtypeStruct((n, C_IN), out_dtype),
        grid=(tiles,),
        in_specs=[
            pl.BlockSpec((tm, C_IN), lambda i: (i, 0)),          # x: tiled over N
            pl.BlockSpec((C_IN, C_MID_PAD), lambda i: (0, 0)),   # w1: resident
            pl.BlockSpec((1, C_MID_PAD), lambda i: (0, 0)),      # b1: resident
            pl.BlockSpec((C_MID_PAD, C_IN), lambda i: (0, 0)),   # w2: resident
            pl.BlockSpec((1, C_IN), lambda i: (0, 0)),           # b2: resident
        ],
        out_specs=pl.BlockSpec((tm, C_IN), lambda i: (i, 0)),
        compiler_params=pltpu.CompilerParams(
            dimension_semantics=("parallel",)),
        cost_estimate=cost,
    )(x2d, w1_p, b1_p, w2_p, b2_p)

    return out.reshape(n, C_IN, 1, 1)


def _init_params(key):
    """Deterministic init mimicking PyTorch Conv2d default
    (uniform in [-1/sqrt(fan_in), 1/sqrt(fan_in)])."""
    k1, k2, k3, k4 = jax.random.split(key, 4)
    bound1 = 1.0 / (C_IN ** 0.5)   # fan_in of conv2d91 = 336
    bound2 = 1.0 / (C_MID ** 0.5)  # fan_in of conv2d92 = 84
    w1 = jax.random.uniform(k1, (C_MID, C_IN), jnp.float32, -bound1, bound1)
    b1 = jax.random.uniform(k2, (C_MID,), jnp.float32, -bound1, bound1)
    w2 = jax.random.uniform(k3, (C_IN, C_MID), jnp.float32, -bound2, bound2)
    b2 = jax.random.uniform(k4, (C_IN,), jnp.float32, -bound2, bound2)
    return w1, b1, w2, b2


def _reference(x_nchw, w1, b1, w2, b2):
    n = x_nchw.shape[0]
    x2d = x_nchw.reshape(n, C_IN)
    y = jnp.maximum(x2d @ w1.T + b1, 0.0) @ w2.T + b2
    return jax.nn.sigmoid(y).reshape(n, C_IN, 1, 1)


if __name__ == "__main__":
    key = jax.random.PRNGKey(0)
    k_x, k_x2, k_p = jax.random.split(key, 3)

    w1, b1, w2, b2 = _init_params(k_p)
    params = prepare_params(w1, b1, w2, b2)   # hoisted one-time prep

    # Module-shaped small batch ([N, 336, 1, 1]); single tile, block == full array.
    x_small = jax.random.normal(k_x, (2, C_IN, 1, 1), jnp.float32)
    out_small = jax.block_until_ready(se_block(x_small, *params))
    ref_small = _reference(x_small, w1, b1, w2, b2)
    assert out_small.shape == (2, C_IN, 1, 1)
    assert out_small.dtype == jnp.bfloat16
    assert jnp.max(jnp.abs(out_small.astype(jnp.float32) - ref_small)) < 2e-2

    # Awkward batch: 2 even grid steps of 304 rows, masked partial last block.
    x_big = jax.random.normal(k_x2, (600, C_IN, 1, 1), jnp.float32)
    out_big = jax.block_until_ready(se_block(x_big, *params))
    ref_big = _reference(x_big, w1, b1, w2, b2)
    assert out_big.shape == (600, C_IN, 1, 1)
    assert jnp.max(jnp.abs(out_big.astype(jnp.float32) - ref_big)) < 2e-2

    # f32-output path (exact PyTorch output dtype) also exercised.
    out_f32 = jax.block_until_ready(se_block(x_big, *params, out_dtype=jnp.float32))
    assert out_f32.dtype == jnp.float32
    assert jnp.max(jnp.abs(out_f32 - ref_big)) < 2e-2

    print("KERNEL_OK")
</pallas_src>

<mosaic_0001>
module attributes {stable_mosaic.version = 11 : i64} {
  func.func @se_block_kernel(%arg0: i32, %arg1: memref<2x336xf32, #tpu.memory_space<vmem>>, %arg2: memref<336x128xbf16, #tpu.memory_space<vmem>>, %arg3: memref<1x128xf32, #tpu.memory_space<vmem>>, %arg4: memref<128x336xbf16, #tpu.memory_space<vmem>>, %arg5: memref<1x336xf32, #tpu.memory_space<vmem>>, %arg6: memref<2x336xbf16, #tpu.memory_space<vmem>>) attributes {dimension_semantics = [#tpu.dimension_semantics<parallel>], iteration_bounds = array<i64: 1>, scalar_prefetch = 0 : i64, scratch_operands = 0 : i64, tpu.core_type = #tpu.core_type<tc>, window_params = [{transform_indices = @transform_0, window_bounds = array<i64: 2, 336>}, {pipeline_mode = #tpu.pipeline_mode<synchronous>, transform_indices = @transform_1, window_bounds = array<i64: 336, 128>}, {pipeline_mode = #tpu.pipeline_mode<synchronous>, transform_indices = @transform_2, window_bounds = array<i64: 1, 128>}, {pipeline_mode = #tpu.pipeline_mode<synchronous>, transform_indices = @transform_3, window_bounds = array<i64: 128, 336>}, {pipeline_mode = #tpu.pipeline_mode<synchronous>, transform_indices = @transform_4, window_bounds = array<i64: 1, 336>}, {transform_indices = @transform_5, window_bounds = array<i64: 2, 336>}]} {
    %c0 = arith.constant 0 : index
    %c0_0 = arith.constant 0 : index
    %0 = vector.load %arg1[%c0, %c0_0] : memref<2x336xf32, #tpu.memory_space<vmem>>, vector<2x336xf32>
    %1 = arith.truncf %0 : vector<2x336xf32> to vector<2x336xbf16>
    %c0_1 = arith.constant 0 : index
    %c0_2 = arith.constant 0 : index
    %2 = vector.load %arg2[%c0_1, %c0_2] : memref<336x128xbf16, #tpu.memory_space<vmem>>, vector<336x128xbf16>
    %cst = arith.constant dense<0.000000e+00> : vector<2x128xf32>
    %3 = tpu.matmul %1, %2, %cst {dimension_numbers = #tpu.dot_dimension_numbers<[1], [0], [0], [1], [0, 0, 1, 1], [], []>} : vector<2x336xbf16>, vector<336x128xbf16>, vector<2x128xf32> -> vector<2x128xf32>
    %c0_3 = arith.constant 0 : index
    %c0_4 = arith.constant 0 : index
    %4 = vector.load %arg3[%c0_3, %c0_4] : memref<1x128xf32, #tpu.memory_space<vmem>>, vector<1x128xf32>
    %5 = vector.broadcast %4 : vector<1x128xf32> to vector<2x128xf32>
    %6 = arith.addf %3, %5 : vector<2x128xf32>
    %cst_5 = arith.constant 0.000000e+00 : f32
    %7 = vector.broadcast %cst_5 : f32 to vector<2x128xf32>
    %8 = arith.maximumf %6, %7 : vector<2x128xf32>
    %9 = arith.truncf %8 : vector<2x128xf32> to vector<2x128xbf16>
    %c0_6 = arith.constant 0 : index
    %c0_7 = arith.constant 0 : index
    %10 = vector.load %arg4[%c0_6, %c0_7] : memref<128x336xbf16, #tpu.memory_space<vmem>>, vector<128x336xbf16>
    %cst_8 = arith.constant dense<0.000000e+00> : vector<2x336xf32>
    %11 = tpu.matmul %9, %10, %cst_8 {dimension_numbers = #tpu.dot_dimension_numbers<[1], [0], [0], [1], [0, 0, 1, 1], [], []>} : vector<2x128xbf16>, vector<128x336xbf16>, vector<2x336xf32> -> vector<2x336xf32>
    %c0_9 = arith.constant 0 : index
    %c0_10 = arith.constant 0 : index
    %12 = vector.load %arg5[%c0_9, %c0_10] : memref<1x336xf32, #tpu.memory_space<vmem>>, vector<1x336xf32>
    %13 = vector.broadcast %12 : vector<1x336xf32> to vector<2x336xf32>
    %14 = arith.addf %11, %13 : vector<2x336xf32>
    %15 = arith.truncf %14 : vector<2x336xf32> to vector<2x336xbf16>
    %cst_11 = arith.constant 5.000000e-01 : bf16
    %16 = vector.broadcast %cst_11 : bf16 to vector<2x336xbf16>
    %17 = arith.mulf %15, %16 : vector<2x336xbf16>
    %18 = math.tanh %17 : vector<2x336xbf16>
    %cst_12 = arith.constant 5.000000e-01 : bf16
    %19 = vector.broadcast %cst_12 : bf16 to vector<2x336xbf16>
    %20 = arith.mulf %18, %19 : vector<2x336xbf16>
    %cst_13 = arith.constant 5.000000e-01 : bf16
    %21 = vector.broadcast %cst_13 : bf16 to vector<2x336xbf16>
    %22 = arith.addf %20, %21 : vector<2x336xbf16>
    %c0_14 = arith.constant 0 : index
    %c0_15 = arith.constant 0 : index
    %23 = vector.load %arg6[%c0_14, %c0_15] : memref<2x336xbf16, #tpu.memory_space<vmem>>, vector<2x336xbf16>
    tpu.vector_store %arg6[%c0_14, %c0_15], %22 {strides = array<i32>} : memref<2x336xbf16, #tpu.memory_space<vmem>>, vector<2x336xbf16>,
    return
  }
  func.func @transform_0(%arg0: i32) -> (i32, i32) {
    %c0_i32 = arith.constant 0 : i32
    %c0_i32_0 = arith.constant 0 : i32
    return %arg0, %c0_i32 : i32, i32
  }
  func.func @transform_1(%arg0: i32) -> (i32, i32) {
    %c0_i32 = arith.constant 0 : i32
    %c0_i32_0 = arith.constant 0 : i32
    %c0_i32_1 = arith.constant 0 : i32
    return %c0_i32, %c0_i32_0 : i32, i32
  }
  func.func @transform_2(%arg0: i32) -> (i32, i32) {
    %c0_i32 = arith.constant 0 : i32
    %c0_i32_0 = arith.constant 0 : i32
    %c0_i32_1 = arith.constant 0 : i32
    return %c0_i32, %c0_i32_0 : i32, i32
  }
  func.func @transform_3(%arg0: i32) -> (i32, i32) {
    %c0_i32 = arith.constant 0 : i32
    %c0_i32_0 = arith.constant 0 : i32
    %c0_i32_1 = arith.constant 0 : i32
    return %c0_i32, %c0_i32_0 : i32, i32
  }
  func.func @transform_4(%arg0: i32) -> (i32, i32) {
    %c0_i32 = arith.constant 0 : i32
    %c0_i32_0 = arith.constant 0 : i32
    %c0_i32_1 = arith.constant 0 : i32
    return %c0_i32, %c0_i32_0 : i32, i32
  }
  func.func @transform_5(%arg0: i32) -> (i32, i32) {
    %c0_i32 = arith.constant 0 : i32
    %c0_i32_0 = arith.constant 0 : i32
    return %arg0, %c0_i32 : i32, i32
  }
}

</mosaic_0001>

<bundles_post_ra>
// kernel: se_block.1
= control target key start
LH: loop header
LB: loop body
LE: loop exit
PB: predicated region body
PF: predicated region fallthrough
CT: control target
= control target key end

     0   :  { %v836_v2 = vmov 0.0   ;;  %vm837_vm0 = vmmov 0   ;;  %v29_v15 = vlaneseq  ;;  %v838_v20 = vmov 1983009808   ;;  %s1052_s0 = inlined_call_operand.vmem [shape: f32[2,336], index: 0, kind: input, shape index: {}]   ;;  %s1053_s1 = inlined_call_operand.vmem [shape: bf16[336,128], index: 1, kind: input, shape index: {}]   ;;  %s1054_s2 = inlined_call_operand.vmem [shape: f32[1,128], index: 2, kind: input, shape index: {}]   ;;  %s1055_s3 = inlined_call_operand.vmem [shape: bf16[128,336], index: 3, kind: input, shape index: {}]   ;;  %s1056_s4 = inlined_call_operand.vmem [shape: f32[1,336], index: 4, kind: input, shape index: {}]   ;;  %s1057_s5 = inlined_call_operand.hbm [shape: bf16[2,336], index: 5, kind: output, shape index: {}]  }
   0x1   :  { %v752_v0 = vld [vmem:[%s1053_s1 + $0x40] sm:$0xff]   ;;  %712 = vmatprep.subr.bf16.mxu1 %v836_v2  ;;  %v754_v3 = vld [vmem:[%s1053_s1 + $0x48] sm:$0xff]   ;;  %722 = vmatprep.mubr.msk.bf16.mxu1 %vm837_vm0, %v836_v2  ;;  %v756_v5 = vld [vmem:[%s1053_s1 + $0x50] sm:$0xff]   ;;  %v27_v21 = vunpack.c.l.s4 %v838_v20  ;;  %vm222_vm1 = vcmask 654336  }
   0x2   :  { %v753_v1 = vld [vmem:[%s1053_s1] sm:$0xff]   ;;  %675 = vmatprep.subr.bf16.mxu0 %v752_v0  ;;  %v755_v4 = vld [vmem:[%s1053_s1 + $0x8] sm:$0xff]   ;;  %v757_v6 = vld [vmem:[%s1053_s1 + $0x10] sm:$0xff]   ;;  %v932_v22 = vshrl.u32 %v29_v15, 7 }
   0x3   :  { %676 = vmatpush3.bf16.msra.mxu0 %v753_v1  ;;  %v758_v7 = vld [vmem:[%s1053_s1 + $0x58] sm:$0xff]   ;;  %v760_v8 = vld [vmem:[%s1053_s1 + $0x80] sm:$0xff]   ;;  %v763_v10 = vld [vmem:[%s1053_s1 + $0x88] sm:$0xff]   ;;  %v28_v26 = vunpack.c.0.s8 %v27_v21 }
   0x4   :  { %677 = vmatprep.subr.bf16.mxu0 %v754_v3  ;;  %v759_v9 = vld [vmem:[%s1053_s1 + $0x18] sm:$0xff]   ;;  %713 = vmatpush3.bf16.msra.mxu1 %v760_v8  ;;  %v761_v11 = vld [vmem:[%s1053_s1 + $0x60] sm:$0xff]   ;;  %v766_v12 = vld [vmem:[%s1053_s1 + $0x90] sm:$0xff]  }
   0x5   :  { %714 = vmatprep.subr.bf16.mxu1 %v836_v2  ;;  %v762_v13 = vld [vmem:[%s1053_s1 + $0x20] sm:$0xff]   ;;  %v764_v14 = vld [vmem:[%s1053_s1 + $0x68] sm:$0xff]   ;;  %v769_v16 = vld [vmem:[%s1053_s1 + $0x98] sm:$0xff]   ;;  %v31_v29 = vsub.s32 %v28_v26, %v932_v22 }
   0x6   :  { %v765_v17 = vld [vmem:[%s1053_s1 + $0x28] sm:$0xff]   ;;  %v767_v18 = vld [vmem:[%s1053_s1 + $0x70] sm:$0xff]   ;;  %v23_v23 = vld [vmem:[%s1052_s0] sm:$0x3f] }
   0x7   :  { %678 = vmatpush3.bf16.msra.mxu0 %v755_v4  ;;  %v768_v19 = vld [vmem:[%s1053_s1 + $0x30] sm:$0xff]   ;;  %v773_v24 = vld [vmem:[%s1053_s1 + $0xa0] sm:$0xff]   ;;  %v25_v25 = vcombine.high %v23_v23, %v23_v23  ;;  %v770_v28 = vld [vmem:[%s1053_s1 + $0x78] sm:$0xff]   ;;  %v32_v31 = vrot.slane %v23_v23, %v31_v29 }
   0x8   :  { %679 = vmatprep.subr.bf16.mxu0 %v756_v5  ;;  %715 = vmatpush3.bf16.msra.mxu1 %v763_v10  ;;  %v776_v27 = vld [vmem:[%s1055_s3 + $0x4] ss:$12 sps:$4 sm:$0xff]   ;;  %v771_v30 = vld [vmem:[%s1053_s1 + $0x38] sm:$0xff]   ;;  %v774_v33 = vld [vmem:[%s1055_s3] ss:$12 sps:$4 sm:$0xff]  }
   0x9   :  { %716 = vmatprep.subr.bf16.mxu1 %v836_v2  ;;  %v39_v32 = vrot.slane %v25_v25, %v31_v29  ;;  %v40_v34 = vcombine.high %v32_v31, %v32_v31  ;;  %v780_v36 = vld [vmem:[%s1055_s3 + $0x1c] ss:$12 sps:$4 sm:$0xff]   ;;  %v44_v37 = vpack.c.bf16 %v32_v31, %v32_v31  ;;  %v778_v40 = vld [vmem:[%s1055_s3 + $0x18] ss:$12 sps:$4 sm:$0xff]   ;;  %v781_v41 = vld [vmem:[%s1055_s3 + $0x20] ss:$12 sps:$4 sm:$0xff]  }
   0xa   :  { %v777_v39 = vld [vmem:[%s1055_s3 + $0x8] ss:$12 sps:$4 sm:$0xff]   ;;  %v782_v43 = vld [vmem:[%s1055_s3 + $0x30] ss:$12 sps:$4 sm:$0xff]   ;;  %v788_v44 = vld [vmem:[%s1055_s3 + $0x4c] ss:$12 sps:$4 sm:$0xff]  }
   0xb   :  { %680 = vmatpush3.bf16.msra.mxu0 %v757_v6  ;;  %v46_v35 = vpack.c.bf16 %v39_v32, %v39_v32  ;;  %v45_v38 = vpack.c.bf16 %v40_v34, %v40_v34  ;;  %v784_v42 = vld [vmem:[%s1055_s3 + $0x34] ss:$12 sps:$4 sm:$0xff]  }
   0xc   :  { %681 = vmatprep.subr.bf16.mxu0 %v758_v7  ;;  %717 = vmatpush3.bf16.msra.mxu1 %v766_v12 }
   0xd   :  { %718 = vmatprep.subr.bf16.mxu1 %v836_v2  ;;  %258 = vmatprep.mubr.bf16.mxu0 %v45_v38 }
   0xf   :  { %682 = vmatpush3.bf16.msra.mxu0 %v759_v9 }
  0x10   :  { %683 = vmatprep.subr.bf16.mxu0 %v761_v11  ;;  %719 = vmatpush3.bf16.msra.mxu1 %v769_v16 }
  0x11   :  { %720 = vmatprep.subr.bf16.mxu1 %v836_v2 }
  0x13   :  { %684 = vmatpush3.bf16.msra.mxu0 %v762_v13 }
  0x14   :  { %685 = vmatprep.subr.bf16.mxu0 %v764_v14  ;;  %721 = vmatpush3.bf16.msra.mxu1 %v773_v24 }
  0x15   :  { %485 = vmatprep.subr.bf16.mxu1 %v776_v27 }
  0x17   :  { %686 = vmatpush3.bf16.msra.mxu0 %v765_v17  ;;  %723 = vmatmul.mubr.msk.bf16.vlgmr.msra.gmra.mrb[0].mxu1 %vm222_vm1, %v46_v35 }
  0x18   :  { %687 = vmatprep.subr.bf16.mxu0 %v767_v18  ;;  %486 = vmatpush1.bf16.msra.mxu1 %v774_v33 }
  0x19   :  { %487 = vmatprep.subr.bf16.mxu1 %v780_v36 }
  0x1b   :  { %688 = vmatpush3.bf16.msra.mxu0 %v768_v19 }
  0x1c   :  { %689 = vmatprep.subr.bf16.mxu0 %v770_v28  ;;  %488 = vmatpush1.bf16.msra.mxu1 %v778_v40 }
  0x1d   :  { %489 = vmatprep.subr.bf16.mxu1 %v784_v42 }
  0x1f   :  { %690 = vmatpush3.bf16.msra.mxu0 %v771_v30 }
  0x20   :  { %726 = vmatprep.subr.bf16.mxu0 %v836_v2 }
  0x22   :  { %259 = vmatmul.mubr.bf16.vlgmr.msra.gmra.mrb[0].mxu0 %v44_v37 }
  0x23   :  { %727 = vmatpush3.bf16.msra.mxu0 %v777_v39  ;;  %742 = vmatprep.mubr.msk.bf16.mxu0 %vm837_vm0, %v836_v2 }
  0x24   :  { %728 = vmatprep.subr.bf16.mxu0 %v836_v2 }
  0x25   :  { %10 = vsyncpa [#allocation3], 0  ;;  %v785_v45 = vld [vmem:[%s1055_s3 + $0x38] ss:$12 sps:$4 sm:$0xff]   ;;  %490 = vmatpush1.bf16.msra.mxu1 %v782_v43  ;;  %v786_v46 = vld [vmem:[%s1055_s3 + $0x48] ss:$12 sps:$4 sm:$0xff]  }
  0x26   :  { %491 = vmatprep.subr.bf16.mxu1 %v788_v44  ;;  %v792_v47 = vld [vmem:[%s1055_s3 + $0x64] ss:$12 sps:$4 sm:$0xff]   ;;  %v790_v49 = vld [vmem:[%s1055_s3 + $0x60] ss:$12 sps:$4 sm:$0xff]   ;;  %v793_v50 = vld [vmem:[%s1055_s3 + $0x68] ss:$12 sps:$4 sm:$0xff]  }
  0x27   :  { %729 = vmatpush3.bf16.msra.mxu0 %v781_v41  ;;  %v789_v48 = vld [vmem:[%s1055_s3 + $0x50] ss:$12 sps:$4 sm:$0xff]   ;;  %v794_v52 = vld [vmem:[%s1055_s3 + $0x78] ss:$12 sps:$4 sm:$0xff]   ;;  %v797_v53 = vld [vmem:[%s1055_s3 + $0x80] ss:$12 sps:$4 sm:$0xff]  }
  0x28   :  { %730 = vmatprep.subr.bf16.mxu0 %v836_v2  ;;  %v796_v51 = vld [vmem:[%s1055_s3 + $0x7c] ss:$12 sps:$4 sm:$0xff]   ;;  %v800_v54 = vld [vmem:[%s1055_s3 + $0x94] ss:$12 sps:$4 sm:$0xff]   ;;  %v801_v56 = vld [vmem:[%s1055_s3 + $0x98] ss:$12 sps:$4 sm:$0xff]  }
  0x29   :  { %492 = vmatpush1.bf16.msra.mxu1 %v786_v46  ;;  %v798_v55 = vld [vmem:[%s1055_s3 + $0x90] ss:$12 sps:$4 sm:$0xff]   ;;  %v804_v57 = vld [vmem:[%s1055_s3 + $0xac] ss:$12 sps:$4 sm:$0xff]   ;;  %v802_v58 = vld [vmem:[%s1055_s3 + $0xa8] ss:$12 sps:$4 sm:$0xff]  }
  0x2a   :  { %493 = vmatprep.subr.bf16.mxu1 %v792_v47  ;;  %v805_v59 = vld [vmem:[%s1055_s3 + $0xb0] ss:$12 sps:$4 sm:$0xff]   ;;  %v839_v60 = vmov 0   ;;  %v344_v11 = vsub.s32 0, %v932_v22  ;;  %v352_v12 = vsub.s32 2, %v932_v22  ;;  %v348_v14 = vsub.s32 1, %v932_v22 }
  0x2b   :  { %731 = vmatpush3.bf16.msra.mxu0 %v785_v45  ;;  %517 = vmatprep.mubr.bf16.mxu1 %v839_v60  ;;  %v340_v13 = vld [vmem:[%s1056_s4] sm:$0x7]  ;;  %v840_v36 = vmov 1966171168   ;;  %vm608_vm2 = vcmask 1040384   ;;  %vm609_vm3 = vcmask 1041409  }
  0x2c   :  { %732 = vmatprep.subr.bf16.mxu0 %v836_v2  ;;  %v345_v15 = vrot.slane %v340_v13, %v344_v11  ;;  %v353_v16 = vrot.slane %v340_v13, %v352_v12  ;;  %v349_v17 = vrot.slane %v340_v13, %v348_v14  ;;  %v586_v37 = vunpack.c.l.s4 %v840_v36  ;;  %vm610_vm4 = vmor %vm609_vm3, %vm608_vm2 }
  0x2d   :  { %494 = vmatpush1.bf16.msra.mxu1 %v790_v49  ;;  %vm611_vm5 = vcmask 649218  }
  0x2e   :  { %495 = vmatprep.subr.bf16.mxu1 %v796_v51  ;;  %v587_v41 = vunpack.c.0.s8 %v586_v37  ;;  %vm612_vm6 = vmor %vm611_vm5, %vm610_vm4 }
  0x2f   :  { %733 = vmatpush3.bf16.msra.mxu0 %v789_v48 }
  0x30   :  { %734 = vmatprep.subr.bf16.mxu0 %v836_v2  ;;  %v590_v47 = vsub.s32 %v587_v41, %v932_v22 }
  0x31   :  { %496 = vmatpush1.bf16.msra.mxu1 %v794_v52 }
  0x32   :  { %497 = vmatprep.subr.bf16.mxu1 %v800_v54 }
  0x33   :  { %735 = vmatpush3.bf16.msra.mxu0 %v793_v50 }
  0x34   :  { %736 = vmatprep.subr.bf16.mxu0 %v836_v2 }
  0x35   :  { %498 = vmatpush1.bf16.msra.mxu1 %v798_v55 }
  0x36   :  { %499 = vmatprep.subr.bf16.mxu1 %v804_v57 }
  0x37   :  { %737 = vmatpush3.bf16.msra.mxu0 %v797_v53 }
  0x38   :  { %738 = vmatprep.subr.bf16.mxu0 %v836_v2 }
  0x39   :  { %500 = vmatpush1.bf16.msra.mxu1 %v802_v58 }
  0x3b   :  { %739 = vmatpush3.bf16.msra.mxu0 %v801_v56 }
  0x3c   :  { %740 = vmatprep.subr.bf16.mxu0 %v836_v2  ;;  %v628_v2 = vld [vmem:[%s1054_s2] ss:$0 sm:$0xff]  ;;  %s841_s2 = smov [#allocation2]  }
  0x3d   :  { %s620_s4 = sshll.u32 %s841_s2, 4  ;;  %s621_s4 = int_to_ptr.vmem [resolvable:$true] %s620_s4 }
  0x3e   :  { %s812_s9 = scalar_lea.vmem %s621_s4, 48  ;;  %s816_s10 = scalar_lea.vmem %s621_s4, 64 }
  0x3f   :  { %741 = vmatpush3.bf16.msra.mxu0 %v805_v59  ;;  %p813_p0 = scmp.ne.s32.totalorder %s621_s4, %s812_s9  ;;  %p817_p1 = scmp.lt.s32.totalorder %s621_s4, %s621_s4 }
  0x40   :  { %p818_p2 = scmp.lt.s32.totalorder %s816_s10, %s812_s9 }
  0x42   :  { %p819_p3 = por %p818_p2, %p817_p1 }
  0x44   :  { %p820_p4 = pnand %p819_p3, %p813_p0 }
  0xea   :  { %v300_v61 = vpop.f32.mrb[0].mxu1 }
  0xeb   :  { %v724_v62 = vpop.f32.mrb[1].mxu1 }
  0xec   :  { %v303_v63 = vpop.f32.mrb[2].mxu1 }
  0xed   :  { %v725_v1 = vpop.f32.mrb[3].mxu1 }
  0xf5   :  { %v691_v0 = vpop.f32.mrb[0].mxu0 }
  0xf6   :  { %v692_v3 = vpop.f32.mrb[1].mxu0 }
  0xf7   :  { %v693_v4 = vadd.f32 %v692_v3, %v691_v0  ;;  %v694_v5 = vpop.f32.mrb[2].mxu0 }
  0xf8   :  { %v695_v6 = vpop.f32.mrb[3].mxu0 }
  0xf9   :  { %v261_v7 = vadd.f32 %v693_v4, %v628_v2 }
  0xfb   :  { %v301_v8 = vadd.f32 %v300_v61, %v261_v7 }
  0xfd   :  { %v306_v9 = vmax.f32 %v301_v8, 0.0 }
  0xff   :  { %v307_v10 = vpack.c.bf16 %v306_v9, %v306_v9 }
 0x101   :  { %518 = vmatmul.mubr.bf16.vlgmr.msra.gmra.mrb[4].mxu1 %v307_v10  ;;  %743 = vmatmul.mubr.bf16.vlgmr.msra.gmra.mrb[4].mxu0 %v307_v10 }
 0x1d4   :  { %v519_v18 = vpop.f32.mrb[4].mxu1  ;;  %v560_v19 = vpop.f32.mrb[4].mxu0 }
 0x1d5   :  { %v520_v20 = vadd.f32 %v519_v18, %v345_v15  ;;  %v561_v21 = vadd.f32 %v560_v19, %v353_v16  ;;  %v521_v23 = vpop.f32.mrb[5].mxu1  ;;  %v744_v24 = vpop.f32.mrb[5].mxu0 }
 0x1d6   :  { %v522_v25 = vadd.f32 %v521_v23, %v349_v17  ;;  %v523_v26 = vpop.f32.mrb[6].mxu1  ;;  %v563_v27 = vpop.f32.mrb[6].mxu0 }
 0x1d7   :  { %v566_v28 = vpack.c.bf16 %v520_v20, %v520_v20  ;;  %v568_v29 = vpack.c.bf16 %v561_v21, %v561_v21  ;;  %v524_v30 = vpop.f32.mrb[7].mxu1  ;;  %v745_v31 = vpop.f32.mrb[7].mxu0 }
 0x1d8   :  { %v567_v32 = vpack.c.bf16 %v522_v25, %v522_v25 }
 0x1d9   :  { %v569_v33 = vmul.bf16 1056980736, %v566_v28  ;;  %v571_v34 = vmul.bf16 1056980736, %v568_v29 }
 0x1da   :  { %v570_v35 = vmul.bf16 1056980736, %v567_v32 }
 0x1db   :  { %806 = vtanh.bf16 %v569_v33 }
 0x1dc   :  { %808 = vtanh.bf16 %v571_v34 }
 0x1dd   :  { %810 = vtanh.bf16 %v570_v35 }
 0x1e6   :  { %v807_v38 = vpop.eup %806 }
 0x1e7   :  { %v809_v39 = vpop.eup %808  ;;  %v575_v40 = vmul.bf16 1056980736, %v807_v38 }
 0x1e8   :  { %v811_v42 = vpop.eup %810  ;;  %v577_v43 = vmul.bf16 1056980736, %v809_v39 }
 0x1e9   :  { %v578_v44 = vadd.bf16 1056980736, %v575_v40  ;;  %v576_v45 = vmul.bf16 1056980736, %v811_v42 }
 0x1ea   :  { %v580_v46 = vadd.bf16 1056980736, %v577_v43 }
 0x1eb   :  { %v579_v48 = vadd.bf16 1056980736, %v576_v45 }
 0x1ec   :  { %v598_v50 = vrot.slane %v580_v46, %v590_v47 }
 0x1ed   :  { %v584_v49 = vcombine.low %v578_v44, %v579_v48 }
 0x1ef   :  { %v591_v51 = vrot.slane %v584_v49, %v590_v47 }
 0x1f1   :  { %v599_v52 = vcombine.low %v591_v51, %v598_v50 }
 0x1f3   :  { %v606_v53 = vrot.slane %v599_v52, %v590_v47 }
 0x1f5   :  { %613 = vst.msk [vmem:[#allocation2] sm:$0x7] %vm612_vm6, %v606_v53 }
 0x1f6   :  { %823 = shalt.err (!%p820_p4)
}
 0x1f7   :  { %s824_s12 = scalar_lea.hbm %s1057_s5, 48 }
 0x1f8   :  { %p825_p5 = scmp.ne.s32.totalorder %s1057_s5, %s824_s12  ;;  %p828_p6 = scmp.lt.u32.totalorder %s824_s12, %s1057_s5 }
 0x1fa   :  { %p830_p7 = pnand %p828_p6, %p825_p5 }
 0x1fc   :  { %833 = shalt.err (!%p830_p7)
}
 0x1fd   :  { %623 = dma.vmem_to_hbm [thread:$0]  %s621_s4, 48, %s1057_s5, [#allocation3]  }
 0x1fe   :  { %834 = dma.done.wait [#allocation3], 48  }
 0x1ff   :  { %835 = vsyncadd [#allocation3], 4294967248 }
 0x200   :  { %627 = vsyncpa [#allocation3], 1 }

</bundles_post_ra>
